<compile_context>
chip_gen: v7x
topology: tpu7x:2x2x1
jax: 0.10.0
libtpu: 0.0.40
codegen_flags: <defaults>
</compile_context>

<pallas_src>
import functools

import jax
import jax.numpy as jnp
from jax.experimental import pallas as pl
from jax.experimental.pallas import tpu as pltpu


def _round_up(x, m):
    return (x + m - 1) // m * m


def _conv_stats_kernel(x_ref, w_ref, y_ref, stats_ref):
    """One row tile: fused im2col matmul + partial BN sums for this tile.

    x_ref:     (tm, KCp)      im2col rows for this tile (zero-padded rows/cols)
    w_ref:     (KCp, COp)     full weight, resident across grid steps
    y_ref:     (tm, COp)      conv output tile (f32)
    stats_ref: (1, 2, COp)    this tile's [sum, sum_of_squares] per channel
    """
    y = jnp.dot(x_ref[...], w_ref[...], preferred_element_type=jnp.float32)
    y_ref[...] = y.astype(y_ref.dtype)
    s1 = jnp.sum(y, axis=0, keepdims=True)       # (1, COp)
    s2 = jnp.sum(y * y, axis=0, keepdims=True)   # (1, COp)
    stats_ref[...] = jnp.concatenate([s1, s2], axis=0)[None]


def _bn_relu_kernel(y_ref, scale_ref, shift_ref, o_ref):
    """One row tile: y * scale + shift, then ReLU (scale/shift fold BN affine)."""
    y = y_ref[...] * scale_ref[...] + shift_ref[...]
    o_ref[...] = jnp.maximum(y, 0.0).astype(o_ref.dtype)


def aspp_forward(x_nchw, weight_oihw, gamma, beta, *, rate, eps=1e-5,
                 tm=256, matmul_dtype=None):
    """Forward pass matching ASPP_module.forward. x_nchw: (N, Cin, H, W)."""
    N, Cin, H, W = x_nchw.shape
    Cout, _, K, _ = weight_oihw.shape
    pad = 0 if K == 1 else rate

    # ---- Glue: layout staging only (transpose / pad / shifted views) ----------
    x_nhwc = jnp.transpose(x_nchw, (0, 2, 3, 1))
    xpad = jnp.pad(x_nhwc, ((0, 0), (pad, pad), (pad, pad), (0, 0)))
    # im2col slab (M, K*K*Cin); column order (kh, kw, cin) matches the weight
    # reshape below so one matmul computes all taps at once.
    patches = [xpad[:, kh * rate:kh * rate + H, kw * rate:kw * rate + W, :]
               for kh in range(K) for kw in range(K)]
    x2d = jnp.concatenate(patches, axis=-1).reshape(N * H * W, K * K * Cin)
    w2d = jnp.transpose(weight_oihw, (2, 3, 1, 0)).reshape(K * K * Cin, Cout)

    if matmul_dtype is not None:
        x2d = x2d.astype(matmul_dtype)
        w2d = w2d.astype(matmul_dtype)

    M, KC = x2d.shape
    Mp = _round_up(M, tm)          # row-tile multiple
    KCp = _round_up(KC, 128)       # lane-dense contraction dim
    COp = _round_up(Cout, 128)     # lane-dense output channels (unmasked vst)

    x2d = jnp.pad(x2d, ((0, Mp - M), (0, KCp - KC)))
    w2d = jnp.pad(w2d, ((0, KCp - KC), (0, COp - Cout)))

    n_tiles = Mp // tm
    # Per-step VMEM with tm=256: 2*(tm*KCp + KCp*COp + tm*COp)*4B + stats ≪ 16 MiB,
    # so this fits every generation's default scoped-VMEM budget; cap set explicitly.
    params = pltpu.CompilerParams(dimension_semantics=("parallel",),
                                  vmem_limit_bytes=32 * 1024 * 1024)

    # ---- Pass 1: tiled fused conv matmul + per-tile partial BN stats ----------
    y2d, part = pl.pallas_call(
        _conv_stats_kernel,
        grid=(n_tiles,),
        in_specs=[pl.BlockSpec((tm, KCp), lambda i: (i, 0)),
                  pl.BlockSpec((KCp, COp), lambda i: (0, 0))],
        out_specs=[pl.BlockSpec((tm, COp), lambda i: (i, 0)),
                   pl.BlockSpec((1, 2, COp), lambda i: (i, 0, 0))],
        out_shape=[jax.ShapeDtypeStruct((Mp, COp), jnp.float32),
                   jax.ShapeDtypeStruct((n_tiles, 2, COp), jnp.float32)],
        compiler_params=params,
    )(x2d, w2d)

    # ---- O(Cout) glue: combine per-tile partials -> BN scale/shift ------------
    # Zero-padded rows contribute nothing to the sums, so divide by the real count.
    totals = jnp.sum(part, axis=0)                     # (2, COp)
    count = N * H * W
    mean = totals[0] / count
    var = jnp.maximum(totals[1] / count - mean * mean, 0.0)   # biased batch variance
    inv = jax.lax.rsqrt(var + eps)
    gamma_p = jnp.pad(gamma.astype(jnp.float32), (0, COp - Cout), constant_values=1.0)
    beta_p = jnp.pad(beta.astype(jnp.float32), (0, COp - Cout))
    scale1d = inv * gamma_p
    shift1d = beta_p - mean * scale1d
    scale = scale1d.reshape(1, COp)
    shift = shift1d.reshape(1, COp)

    # ---- Pass 2: tiled normalize + ReLU ---------------------------------------
    out2d = pl.pallas_call(
        _bn_relu_kernel,
        grid=(n_tiles,),
        in_specs=[pl.BlockSpec((tm, COp), lambda i: (i, 0)),
                  pl.BlockSpec((1, COp), lambda i: (0, 0)),
                  pl.BlockSpec((1, COp), lambda i: (0, 0))],
        out_specs=pl.BlockSpec((tm, COp), lambda i: (i, 0)),
        out_shape=jax.ShapeDtypeStruct((Mp, COp), x_nchw.dtype),
        compiler_params=params,
    )(y2d, scale, shift)

    out = out2d[:M, :Cout].reshape(N, H, W, Cout)
    return jnp.transpose(out, (0, 3, 1, 2))  # back to NCHW


def _reference(x_nchw, weight_oihw, gamma, beta, *, rate, eps=1e-5):
    """Pure-JAX reference (lax conv + batch-stat BN + ReLU) for validation."""
    K = weight_oihw.shape[2]
    pad = 0 if K == 1 else rate
    x_nhwc = jnp.transpose(x_nchw, (0, 2, 3, 1))
    w_hwio = jnp.transpose(weight_oihw, (2, 3, 1, 0))
    y = jax.lax.conv_general_dilated(
        x_nhwc.astype(jnp.float32), w_hwio.astype(jnp.float32),
        window_strides=(1, 1), padding=[(pad, pad), (pad, pad)],
        rhs_dilation=(rate, rate),
        dimension_numbers=("NHWC", "HWIO", "NHWC"))
    mean = jnp.mean(y, axis=(0, 1, 2), keepdims=True)
    var = jnp.mean((y - mean) ** 2, axis=(0, 1, 2), keepdims=True)
    y = (y - mean) * jax.lax.rsqrt(var + eps) * gamma + beta
    y = jnp.maximum(y, 0.0)
    return jnp.transpose(y, (0, 3, 1, 2)).astype(x_nchw.dtype)


if __name__ == "__main__":
    inplanes, planes, rate = 4, 8, 2          # rate != 1 -> kernel_size=3, padding=rate
    N, H, W = 2, 16, 16
    K = 1 if rate == 1 else 3

    key = jax.random.PRNGKey(0)
    kx, kw = jax.random.split(key)
    x = jax.random.normal(kx, (N, inplanes, H, W), dtype=jnp.float32)

    # Deterministic parameter init mirroring _init_weight():
    #   conv weight: kaiming normal (std = sqrt(2 / fan_in), fan_in = Cin*K*K), no bias
    #   BN: gamma = 1, beta = 0
    fan_in = inplanes * K * K
    weight = jax.random.normal(kw, (planes, inplanes, K, K), dtype=jnp.float32) * jnp.sqrt(2.0 / fan_in)
    gamma = jnp.ones((planes,), dtype=jnp.float32)
    beta = jnp.zeros((planes,), dtype=jnp.float32)

    out = aspp_forward(x, weight, gamma, beta, rate=rate)
    out = jax.block_until_ready(out)

    ref = _reference(x, weight, gamma, beta, rate=rate)
    assert out.shape == (N, planes, H, W)
    assert jnp.allclose(out, ref, atol=1e-4, rtol=1e-4), "mismatch vs JAX reference"

    print("KERNEL_OK")
</pallas_src>

<mosaic_0001>
module attributes {stable_mosaic.version = 11 : i64} {
  func.func @_conv_stats_kernel(%arg0: i32, %arg1: memref<256x128xf32, #tpu.memory_space<vmem>>, %arg2: memref<128x128xf32, #tpu.memory_space<vmem>>, %arg3: memref<256x128xf32, #tpu.memory_space<vmem>>, %arg4: memref<1x2x128xf32, #tpu.memory_space<vmem>>) attributes {dimension_semantics = [#tpu.dimension_semantics<parallel>], iteration_bounds = array<i64: 2>, scalar_prefetch = 0 : i64, scratch_operands = 0 : i64, tpu.core_type = #tpu.core_type<tc>, window_params = [{transform_indices = @transform_0, window_bounds = array<i64: 256, 128>}, {pipeline_mode = #tpu.pipeline_mode<synchronous>, transform_indices = @transform_1, window_bounds = array<i64: 128, 128>}, {transform_indices = @transform_2, window_bounds = array<i64: 256, 128>}, {transform_indices = @transform_3, window_bounds = array<i64: 1, 2, 128>}]} {
    %c0 = arith.constant 0 : index
    %c0_0 = arith.constant 0 : index
    %0 = vector.load %arg1[%c0, %c0_0] : memref<256x128xf32, #tpu.memory_space<vmem>>, vector<256x128xf32>
    %c0_1 = arith.constant 0 : index
    %c0_2 = arith.constant 0 : index
    %1 = vector.load %arg2[%c0_1, %c0_2] : memref<128x128xf32, #tpu.memory_space<vmem>>, vector<128x128xf32>
    %cst = arith.constant dense<0.000000e+00> : vector<256x128xf32>
    %2 = tpu.matmul %0, %1, %cst {dimension_numbers = #tpu.dot_dimension_numbers<[1], [0], [0], [1], [0, 0, 1, 1], [], []>} : vector<256x128xf32>, vector<128x128xf32>, vector<256x128xf32> -> vector<256x128xf32>
    %c0_3 = arith.constant 0 : index
    %c0_4 = arith.constant 0 : index
    %3 = vector.load %arg3[%c0_3, %c0_4] : memref<256x128xf32, #tpu.memory_space<vmem>>, vector<256x128xf32>
    tpu.vector_store %arg3[%c0_3, %c0_4], %2 {strides = array<i32>} : memref<256x128xf32, #tpu.memory_space<vmem>>, vector<256x128xf32>,
    %cst_5 = arith.constant dense<0.000000e+00> : vector<128xf32>
    %4 = vector.multi_reduction <add>, %2, %cst_5 [0] : vector<256x128xf32> to vector<128xf32>
    %5 = vector.shape_cast %4 : vector<128xf32> to vector<1x128xf32>
    %6 = arith.mulf %2, %2 : vector<256x128xf32>
    %cst_6 = arith.constant dense<0.000000e+00> : vector<128xf32>
    %7 = vector.multi_reduction <add>, %6, %cst_6 [0] : vector<256x128xf32> to vector<128xf32>
    %8 = vector.shape_cast %7 : vector<128xf32> to vector<1x128xf32>
    %9 = tpu.concatenate %5, %8 in 0 : vector<1x128xf32>, vector<1x128xf32> -> vector<2x128xf32>
    %10 = vector.shape_cast %9 : vector<2x128xf32> to vector<1x2x128xf32>
    %c0_7 = arith.constant 0 : index
    %c0_8 = arith.constant 0 : index
    %c0_9 = arith.constant 0 : index
    %11 = vector.load %arg4[%c0_7, %c0_8, %c0_9] : memref<1x2x128xf32, #tpu.memory_space<vmem>>, vector<1x2x128xf32>
    tpu.vector_store %arg4[%c0_7, %c0_8, %c0_9], %10 {strides = array<i32>} : memref<1x2x128xf32, #tpu.memory_space<vmem>>, vector<1x2x128xf32>,
    return
  }
  func.func @transform_0(%arg0: i32) -> (i32, i32) {
    %c0_i32 = arith.constant 0 : i32
    %c0_i32_0 = arith.constant 0 : i32
    return %arg0, %c0_i32 : i32, i32
  }
  func.func @transform_1(%arg0: i32) -> (i32, i32) {
    %c0_i32 = arith.constant 0 : i32
    %c0_i32_0 = arith.constant 0 : i32
    %c0_i32_1 = arith.constant 0 : i32
    return %c0_i32, %c0_i32_0 : i32, i32
  }
  func.func @transform_2(%arg0: i32) -> (i32, i32) {
    %c0_i32 = arith.constant 0 : i32
    %c0_i32_0 = arith.constant 0 : i32
    return %arg0, %c0_i32 : i32, i32
  }
  func.func @transform_3(%arg0: i32) -> (i32, i32, i32) {
    %c0_i32 = arith.constant 0 : i32
    %c0_i32_0 = arith.constant 0 : i32
    %c0_i32_1 = arith.constant 0 : i32
    return %arg0, %c0_i32, %c0_i32_0 : i32, i32, i32
  }
}

</mosaic_0001>

<bundles_post_ra>
// kernel: tpu_custom_call.1
= control target key start
LH: loop header
LB: loop body
LE: loop exit
PB: predicated region body
PF: predicated region fallthrough
CT: control target
= control target key end

     0   :  { %9 = vsyncpa [#allocation3], 0  ;;  %s1638_s0 = inlined_call_operand.hbm [shape: f32[512,128], index: 0, kind: input, shape index: {}]   ;;  %s1639_s1 = inlined_call_operand.hbm [shape: f32[128,128], index: 1, kind: input, shape index: {}]   ;;  %s1640_s2 = inlined_call_operand.hbm [shape: f32[512,128], index: 2, kind: output, shape index: {0}]   ;;  %s1641_s3 = inlined_call_operand.hbm [shape: f32[2,2,128], index: 3, kind: output, shape index: {1}]  }
   0x1   :  { %11 = vsyncpa [#allocation3 + $0x1], 0 }
   0x2   :  { %12 = vsyncpa [#allocation6], 0 }
   0x3   :  { %13 = vsyncpa [#allocation4], 0 }
   0x4   :  { %15 = vsyncpa [#allocation4 + $0x1], 0 }
   0x5   :  { %16 = vsyncpa [#allocation9], 0 }
   0x6   :  { %18 = vsyncpa [#allocation9 + $0x1], 0  ;;  %s1231_s12 = smov 0   ;;  %s1233_s13 = smov 0  }
   0x7   :  { %s1235_s14 = smov 0   ;;  %s1237_s15 = smov 0  }
   0x8 LB: > { %s1252_s16 = sadd.s32 4294967295, %s1201_s15   ;;  %s778_s17 = sadd.s32 4294967294, %s1201_s15   ;;  %s1201_s15 = sphi %s1237_s15, %s1661_s15   ;;  %s1197_s14 = sphi %s1235_s14, %s1660_s14   ;;  %s1193_s13 = sphi %s1233_s13, %s1659_s13   ;;  %s1189_s12 = sphi %s1231_s12, %s1658_s12  }
   0x9   : > { %p44_p0 = scmp.ne.s32.totalorder %s1193_s13, %s1189_s12  ;;  %p1642_p1 = scmp.eq.s32.totalorder %s1252_s16, 0 }
   0xa   : > { %p95_p3 = scmp.eq.s32.totalorder %s778_s17, 1  ;;  %p779_p5 = scmp.ge.s32.totalorder %s1201_s15, 1 }
   0xb   : > { %p1261_p4 = por %p1642_p1, %p44_p0  ;;  %p128_p7 = scmp.lt.s32.totalorder %s1201_s15, 3 }
   0xc   : > { %p1266_p6 = por %p95_p3, %p44_p0  ;;  %s1203_s21 = smov [#allocation5]  }
   0xd   : > { %s1645_s18 = scalar_select %p1261_p4, 1, 0 }
   0xe   : > { %s1646_s19 = scalar_select %p1266_p6, 1, 0 }
   0xf   : > { %p1271_p8 = pnand %p779_p5, %p128_p7  ;;  %s140_s22 = sshll.u32 %s1203_s21, 4  ;;  %s1275_s22 = int_to_ptr.vmem [resolvable:$true] %s140_s22 }
  0x10   : > { %s1287_s24 = sadd.s32 1, %s1201_s15   ;;  %s31_s25 = sadd.s32 1, %s1197_s14 }
  0x11   : > { %s1647_s20 = scalar_select %p1271_p8, 1, 0 }
  0x12   : > { %p985_p9 = pneg %p1271_p8  ;;  %s28_s26 = ssub.s32 %s1201_s15, %s1287_s24 }
  0x13   : > { %s1041_s29 = scalar_lea.hbm %s1639_s1, 2048 }
  0x14   : > { %p1282_p11 = pnand %p985_p9, %p1642_p1  ;;  %p1042_p12 = scmp.ne.s32.totalorder %s1639_s1, %s1041_s29 }
  0x15   : > { %p1048_p5 = scmp.lt.u32.totalorder %s1041_s29, %s1639_s1 }
  0x16   : > { %p1043_p13 = pneg %p1282_p11 }
  0x18   : > { %p1044_p0 = pnand %p1043_p13, %p1042_p12 }
  0x1a   : > { %p1045_p3 = pneg %p1044_p0 }
  0x1c   : > { %p1050_p7 = pnand %p1048_p5, %p1045_p3 }
  0x1e   : > { %1053 = shalt.err (!%p1050_p7)
}
  0x1f   : > { %s1054_s7 = scalar_lea.vmem %s1275_s22, 2048  ;;  %p1062_p2 = scmp.lt.s32.totalorder %s1275_s22, %s1275_s22 }
  0x20   : > { %p1055_p9 = scmp.ne.s32.totalorder %s1275_s22, %s1054_s7  ;;  %p1063_p6 = scmp.lt.s32.totalorder %s1054_s7, %s1054_s7 }
  0x22   : > { %p1057_p10 = pnand %p1055_p9, %p1043_p13  ;;  %p1064_p4 = por %p1063_p6, %p1062_p2 }
  0x24   : > { %p1058_p1 = pneg %p1057_p10 }
  0x26   : > { %p1065_p8 = pnand %p1064_p4, %p1058_p1 }
  0x28   : > { %1068 = shalt.err (!%p1065_p8)
}
  0x29   : > { %s1204_s8 = smov 128   ;;  %s1205_s9 = smov 8  }
  0x2a   : > { %988 = dma.hbm_to_vmem [thread:$0]  (!%p1282_p11), %s1639_s1, 2048, %s1275_s22, [#allocation6], %s1204_s8, %s1204_s8, %s1205_s9  }
  0x2b   : > { %p29_p1 = scmp.eq.s32.totalorder %s28_s26, 0  ;;  %p38_p2 = scmp.ne.s32.totalorder %s1197_s14, %s1193_s13 }
  0x2c   : > { %p39_p4 = scmp.eq.s32.totalorder %s1201_s15, 0  ;;  %p1001_p6 = scmp.lt.s32.totalorder %s1201_s15, 2 }
  0x2d   : > { %s1321_s17 = scalar_select %p29_p1, %s1197_s14, %s31_s25  }
  0x2e   : > { %p40_p8 = por %p39_p4, %p38_p2  ;;  %p1649_p10 = scmp.eq.s32.totalorder %s1252_s16, 1 }
  0x2f   : > { %s154_s23 = sand.u32 1, %s1197_s14   ;;  %s797_s27 = sshll.u32 %s1201_s15, 12 }
  0x30   : > { %p1325_p12 = por %p1649_p10, %p38_p2  ;;  %s782_s28 = sshll.u32 %s154_s23, 8 }
  0x31   : > { %s1334_s4 = scalar_lea.hbm %s1638_s0, %s797_s27  ;;  %s158_s22 = scalar_lea.vmem [#allocation2], %s782_s28 }
  0x32   : > { %s165_s25 = sshll.u32 %s158_s22, 4  ;;  %p1336_p11 = pnand %p1001_p6, %p40_p8  ;;  %s1340_s25 = int_to_ptr.vmem [resolvable:$true] %s165_s25 }
  0x33   : > { %s1342_s5 = scalar_lea.sflag [#allocation3], %s154_s23  ;;  %s1069_s6 = scalar_lea.hbm %s1334_s4, 4096 }
  0x34   : > { %p1070_p13 = scmp.ne.s32.totalorder %s1334_s4, %s1069_s6  ;;  %p1071_p0 = pneg %p1336_p11 }
  0x35   : > { %s1074_s11 = scalar_lea.hbm %s1638_s0, 8192  ;;  %p1075_p7 = scmp.lt.u32.totalorder %s1334_s4, %s1638_s0 }
  0x36   : > { %p1072_p3 = pnand %p1071_p0, %p1070_p13  ;;  %p1076_p9 = scmp.lt.u32.totalorder %s1074_s11, %s1069_s6 }
  0x37   : > { %p1078_p2 = scmp.lt.u32.totalorder %s1069_s6, %s1334_s4 }
  0x38   : > { %p1073_p5 = pneg %p1072_p3  ;;  %p1077_p1 = por %p1076_p9, %p1075_p7 }
  0x3a   : > { %p1079_p4 = por %p1078_p2, %p1077_p1 }
  0x3c   : > { %p1080_p6 = pnand %p1079_p4, %p1073_p5 }
  0x3e   : > { %1083 = shalt.err (!%p1080_p6)
}
  0x3f   : > { %s1084_s23 = scalar_lea.vmem %s1340_s25, 4096  ;;  %s1206_s29 = smov [#allocation2]  }
  0x40   : > { %p1085_p8 = scmp.ne.s32.totalorder %s1340_s25, %s1084_s23  ;;  %s1089_s30 = sshll.u32 %s1206_s29, 4  ;;  %s1090_s30 = int_to_ptr.vmem [resolvable:$false] %s1089_s30 }
  0x41   : > { %s1091_s22 = scalar_lea.vmem %s1090_s30, 8192  ;;  %p1092_p3 = scmp.lt.s32.totalorder %s1340_s25, %s1090_s30 }
  0x42   : > { %p1087_p10 = pnand %p1085_p8, %p1071_p0  ;;  %p1093_p7 = scmp.lt.s32.totalorder %s1091_s22, %s1084_s23 }
  0x44   : > { %p1088_p13 = pneg %p1087_p10  ;;  %p1094_p9 = por %p1093_p7, %p1092_p3 }
  0x46   : > { %p1095_p1 = pnand %p1094_p9, %p1088_p13 }
  0x48   : > { %1098 = shalt.err (!%p1095_p1)
}
  0x49   : > { %992 = dma.hbm_to_vmem [thread:$0]  (!%p1336_p11), %s1334_s4, 4096, %s1340_s25, %s1342_s5, %s1204_s8, %s1204_s8, %s1205_s9  }
  0x4a   : > { %p1652_p0 = scmp.ne.s32.totalorder %s1647_s20, 0 }
  0x4b   : > { %s1376_s6 = sand.u32 (!%p1652_p0), 1, %s1193_s13   ;;  %p1653_p5 = scmp.ne.s32.totalorder (!%p1652_p0), %s1645_s18, 0 }
  0x4c   : > { %177 = sbr.rel (%p1652_p0) target bundleno = 439 (0x1b7), region = 28  ;;  %s786_s7 = sshll.u32 (!%p1652_p0), %s1376_s6, 8 }
  0x4d   : > { %s180_s10 = scalar_lea.sflag (!%p1652_p0), [#allocation3], %s1376_s6  ;;  %s1382_s26 = scalar_lea.vmem (!%p1652_p0), [#allocation2], %s786_s7 }
  0x53   : > { %1172 = dma.done.wait (%p1653_p5), %s180_s10, 4096  }
  0x54   : > { %1174 = vsyncadd (%p1653_p5), %s180_s10, 4294963200  ;;  %p1654_p11 = scmp.eq.s32.totalorder %s1252_s16, 0 }
  0x56   : > { %1176 = dma.done.wait (%p1654_p11), [#allocation6], 2048   ;;  %p1655_p2 = pmov %p1654_p11 }
  0x57   : > { %v249_v0 = vld [vmem:[#allocation5] sm:$0xff]  ;;  %v250_v1 = vld [vmem:[#allocation5 + $0x8] sm:$0xff]  ;;  %v251_v2 = vld [vmem:[#allocation5 + $0x10] sm:$0xff]  ;;  %s1428_s18 = scalar_lea.vmem [#allocation7], %s786_s7  ;;  %s798_s20 = sshll.u32 %s1252_s16, 12 }
  0x58   : > { %1178 = vsyncadd (%p1655_p2), [#allocation6], 4294965248  ;;  %v927_v3 = vpack.c.bf16 %v250_v1, %v249_v0  ;;  %v252_v4 = vld [vmem:[#allocation5 + $0x18] sm:$0xff]  ;;  %v253_v6 = vld [vmem:[#allocation5 + $0x20] sm:$0xff]  ;;  %s650_s8 = sshll.u32 %s1428_s18, 4  ;;  %s1503_s25 = scalar_lea.hbm %s1640_s2, %s798_s20  ;;  %s1505_s8 = int_to_ptr.vmem [resolvable:$true] %s650_s8 }
  0x59   : > { %v931_v5 = vpack.c.bf16 %v252_v4, %v251_v2  ;;  %v254_v7 = vld [vmem:[#allocation5 + $0x28] sm:$0xff]  ;;  %v217_v9 = vld [vmem:[%s1382_s26] sm:$0xff]  ;;  %v255_v10 = vld [vmem:[#allocation5 + $0x30] sm:$0xff]  ;;  %s632_s5 = scalar_lea.sflag [#allocation4], %s1376_s6  ;;  %s1099_s11 = scalar_lea.vmem %s1505_s8, 4096 }
  0x5a   : > { %928 = vmatprep.subr.bf16.mxu0 %v927_v3  ;;  %959 = vmatprep.subr.bf16.mxu1 %v927_v3  ;;  %v935_v8 = vpack.c.bf16 %v254_v7, %v253_v6  ;;  %v256_v11 = vld [vmem:[#allocation5 + $0x38] sm:$0xff]  ;;  %v257_v13 = vld [vmem:[#allocation5 + $0x40] sm:$0xff]  ;;  %v258_v14 = vld [vmem:[#allocation5 + $0x48] sm:$0xff]  ;;  %p1100_p4 = scmp.ne.s32.totalorder %s1505_s8, %s1099_s11  ;;  %s1207_s27 = smov [#allocation7]  }
  0x5b   : > { %930 = vmatpush3.bf16.msra.mxu0 %v927_v3  ;;  %967 = vmatpush3.bf16.msra.mxu1 %v927_v3  ;;  %v939_v12 = vpack.c.bf16 %v256_v11, %v255_v10  ;;  %v233_v15 = vld [vmem:[%s1382_s26 + $0x80] sm:$0xff]  ;;  %v943_v16 = vpack.c.bf16 %v258_v14, %v257_v13  ;;  %v259_v17 = vld [vmem:[#allocation5 + $0x50] sm:$0xff]  ;;  %v260_v18 = vld [vmem:[#allocation5 + $0x58] sm:$0xff]  ;;  %s1103_s28 = sshll.u32 %s1207_s27, 4  ;;  %s1104_s28 = int_to_ptr.vmem [resolvable:$false] %s1103_s28 }
  0x5c   : > { %932 = vmatprep.subr.bf16.mxu0 %v931_v5  ;;  %960 = vmatprep.subr.bf16.mxu1 %v931_v5  ;;  %v947_v19 = vpack.c.bf16 %v260_v18, %v259_v17  ;;  %v261_v20 = vld [vmem:[#allocation5 + $0x60] sm:$0xff]  ;;  %v262_v21 = vld [vmem:[#allocation5 + $0x68] sm:$0xff]  ;;  %v263_v23 = vld [vmem:[#allocation5 + $0x70] sm:$0xff]  ;;  %p1101_p6 = pnand %p1100_p4, %p1325_p12  ;;  %s1105_s23 = scalar_lea.vmem %s1104_s28, 8192 }
  0x5d   : > { %879 = vmatprep.mubr.f32.mxu0 %v217_v9  ;;  %903 = vmatprep.mubr.f32.mxu1 %v233_v15  ;;  %v951_v22 = vpack.c.bf16 %v262_v21, %v261_v20  ;;  %v264_v24 = vld [vmem:[#allocation5 + $0x78] sm:$0xff]  ;;  %v218_v26 = vld [vmem:[%s1382_s26 + $0x8] sm:$0xff]  ;;  %v219_v28 = vld [vmem:[%s1382_s26 + $0x10] sm:$0xff]  ;;  %p1106_p10 = scmp.lt.s32.totalorder %s1505_s8, %s1104_s28  ;;  %p1107_p13 = scmp.lt.s32.totalorder %s1105_s23, %s1099_s11 }
  0x5e   : > { %v955_v25 = vpack.c.bf16 %v264_v24, %v263_v23  ;;  %v234_v27 = vld [vmem:[%s1382_s26 + $0x88] sm:$0xff]  ;;  %v235_v29 = vld [vmem:[%s1382_s26 + $0x90] sm:$0xff]  ;;  %v220_v30 = vld [vmem:[%s1382_s26 + $0x18] sm:$0xff]  ;;  %p1102_p8 = pneg %p1101_p6 }
  0x5f   : > { %934 = vmatpush3.bf16.msra.mxu0 %v931_v5  ;;  %968 = vmatpush3.bf16.msra.mxu1 %v931_v5  ;;  %v236_v31 = vld [vmem:[%s1382_s26 + $0x98] sm:$0xff]  ;;  %v221_v32 = vld [vmem:[%s1382_s26 + $0x20] sm:$0xff]  ;;  %v222_v34 = vld [vmem:[%s1382_s26 + $0x28] sm:$0xff]  ;;  %p1108_p3 = por %p1107_p13, %p1106_p10 }
  0x60   : > { %936 = vmatprep.subr.bf16.mxu0 %v935_v8  ;;  %961 = vmatprep.subr.bf16.mxu1 %v935_v8  ;;  %v237_v33 = vld [vmem:[%s1382_s26 + $0xa0] sm:$0xff]  ;;  %v238_v35 = vld [vmem:[%s1382_s26 + $0xa8] sm:$0xff]  ;;  %v223_v36 = vld [vmem:[%s1382_s26 + $0x30] sm:$0xff] }
  0x61   : > { %v239_v37 = vld [vmem:[%s1382_s26 + $0xb0] sm:$0xff]  ;;  %v224_v38 = vld [vmem:[%s1382_s26 + $0x38] sm:$0xff]  ;;  %v225_v40 = vld [vmem:[%s1382_s26 + $0x40] sm:$0xff]  ;;  %p1109_p7 = pnand %p1108_p3, %p1102_p8 }
  0x62   : > { %v240_v39 = vld [vmem:[%s1382_s26 + $0xb8] sm:$0xff]  ;;  %v241_v41 = vld [vmem:[%s1382_s26 + $0xc0] sm:$0xff]  ;;  %v226_v42 = vld [vmem:[%s1382_s26 + $0x48] sm:$0xff] }
  0x63   : > { %938 = vmatpush3.bf16.msra.mxu0 %v935_v8  ;;  %969 = vmatpush3.bf16.msra.mxu1 %v935_v8  ;;  %v242_v43 = vld [vmem:[%s1382_s26 + $0xc8] sm:$0xff]  ;;  %v227_v44 = vld [vmem:[%s1382_s26 + $0x50] sm:$0xff]  ;;  %v228_v46 = vld [vmem:[%s1382_s26 + $0x58] sm:$0xff] }
  0x64   : > { %940 = vmatprep.subr.bf16.mxu0 %v939_v12  ;;  %962 = vmatprep.subr.bf16.mxu1 %v939_v12  ;;  %v243_v45 = vld [vmem:[%s1382_s26 + $0xd0] sm:$0xff]  ;;  %v244_v47 = vld [vmem:[%s1382_s26 + $0xd8] sm:$0xff]  ;;  %v229_v48 = vld [vmem:[%s1382_s26 + $0x60] sm:$0xff] }
  0x65   : > { %v245_v49 = vld [vmem:[%s1382_s26 + $0xe0] sm:$0xff]  ;;  %v230_v50 = vld [vmem:[%s1382_s26 + $0x68] sm:$0xff]  ;;  %v231_v52 = vld [vmem:[%s1382_s26 + $0x70] sm:$0xff] }
  0x66   : > { %v246_v51 = vld [vmem:[%s1382_s26 + $0xe8] sm:$0xff]  ;;  %v247_v53 = vld [vmem:[%s1382_s26 + $0xf0] sm:$0xff]  ;;  %v232_v54 = vld [vmem:[%s1382_s26 + $0x78] sm:$0xff] }
  0x67   : > { %942 = vmatpush3.bf16.msra.mxu0 %v939_v12  ;;  %970 = vmatpush3.bf16.msra.mxu1 %v939_v12  ;;  %v248_v55 = vld [vmem:[%s1382_s26 + $0xf8] sm:$0xff] }
  0x68   : > { %944 = vmatprep.subr.bf16.mxu0 %v943_v16  ;;  %963 = vmatprep.subr.bf16.mxu1 %v943_v16 }
  0x6b   : > { %946 = vmatpush3.bf16.msra.mxu0 %v943_v16  ;;  %971 = vmatpush3.bf16.msra.mxu1 %v943_v16 }
  0x6c   : > { %948 = vmatprep.subr.bf16.mxu0 %v947_v19  ;;  %964 = vmatprep.subr.bf16.mxu1 %v947_v19 }
  0x6f   : > { %950 = vmatpush3.bf16.msra.mxu0 %v947_v19  ;;  %972 = vmatpush3.bf16.msra.mxu1 %v947_v19 }
  0x70   : > { %952 = vmatprep.subr.bf16.mxu0 %v951_v22  ;;  %965 = vmatprep.subr.bf16.mxu1 %v951_v22 }
  0x73   : > { %954 = vmatpush3.bf16.msra.mxu0 %v951_v22  ;;  %973 = vmatpush3.bf16.msra.mxu1 %v951_v22 }
  0x74   : > { %956 = vmatprep.subr.bf16.mxu0 %v955_v25  ;;  %966 = vmatprep.subr.bf16.mxu1 %v955_v25 }
  0x77   : > { %958 = vmatpush3.bf16.msra.mxu0 %v955_v25  ;;  %974 = vmatpush3.bf16.msra.mxu1 %v955_v25 }
  0x7a   : > { %880 = vmatmul.mubr.f32.vlgmr.msra.gmra.mrb[0].mxu0 %v218_v26  ;;  %904 = vmatmul.mubr.f32.vlgmr.msra.gmra.mrb[0].mxu1 %v234_v27 }
  0x7b   : > { %882 = vmatprep.mubr.f32.mxu0 %v219_v28  ;;  %906 = vmatprep.mubr.f32.mxu1 %v235_v29 }
  0x7e   : > { %883 = vmatmul.mubr.f32.gmra.mrb[2].mxu0 %v220_v30  ;;  %907 = vmatmul.mubr.f32.gmra.mrb[2].mxu1 %v236_v31 }
  0x7f   : > { %885 = vmatprep.mubr.f32.mxu0 %v221_v32  ;;  %909 = vmatprep.mubr.f32.mxu1 %v237_v33 }
  0x82   : > { %886 = vmatmul.mubr.f32.gmra.mrb[4].mxu0 %v222_v34  ;;  %910 = vmatmul.mubr.f32.gmra.mrb[4].mxu1 %v238_v35 }
  0x83   : > { %888 = vmatprep.mubr.f32.mxu0 %v223_v36  ;;  %912 = vmatprep.mubr.f32.mxu1 %v239_v37 }
  0x86   : > { %889 = vmatmul.mubr.f32.gmra.mrb[6].mxu0 %v224_v38  ;;  %913 = vmatmul.mubr.f32.gmra.mrb[6].mxu1 %v240_v39 }
  0x87   : > { %891 = vmatprep.mubr.f32.mxu0 %v225_v40  ;;  %915 = vmatprep.mubr.f32.mxu1 %v241_v41 }
  0x8a   : > { %892 = vmatmul.mubr.f32.gmra.mrb[8].mxu0 %v226_v42  ;;  %916 = vmatmul.mubr.f32.gmra.mrb[8].mxu1 %v242_v43 }
  0x8b   : > { %894 = vmatprep.mubr.f32.mxu0 %v227_v44  ;;  %918 = vmatprep.mubr.f32.mxu1 %v243_v45 }
  0x8e   : > { %895 = vmatmul.mubr.f32.gmra.mrb[10].mxu0 %v228_v46  ;;  %919 = vmatmul.mubr.f32.gmra.mrb[10].mxu1 %v244_v47 }
  0x8f   : > { %897 = vmatprep.mubr.f32.mxu0 %v229_v48  ;;  %921 = vmatprep.mubr.f32.mxu1 %v245_v49 }
  0x92   : > { %898 = vmatmul.mubr.f32.gmra.mrb[12].mxu0 %v230_v50  ;;  %922 = vmatmul.mubr.f32.gmra.mrb[12].mxu1 %v246_v51 }
  0x93   : > { %900 = vmatprep.mubr.f32.mxu0 %v231_v52  ;;  %924 = vmatprep.mubr.f32.mxu1 %v247_v53 }
  0x96   : > { %901 = vmatmul.mubr.f32.gmra.mrb[14].mxu0 %v232_v54  ;;  %925 = vmatmul.mubr.f32.gmra.mrb[14].mxu1 %v248_v55 }
 0x14d   : > { %v881_v56 = vpop.f32.mrb[0].mxu0  ;;  %v1424_v57 = vpop.f32.mrb[0].mxu1 }
 0x14e   : > { %491 = vst [vmem:[%s1428_s18 + $0x8] sm:$0xff] %v881_v56  ;;  %v560_v58 = vmul.f32 %v881_v56, %v881_v56  ;;  %v331_v59 = vpop.f32.mrb[1].mxu0  ;;  %507 = vst [vmem:[%s1428_s18 + $0x88] sm:$0xff] %v1424_v57  ;;  %v1433_v60 = vpop.f32.mrb[1].mxu1 }
 0x14f   : > { %490 = vst [vmem:[%s1428_s18] sm:$0xff] %v331_v59  ;;  %v522_v61 = vadd.f32 %v881_v56, %v331_v59  ;;  %v559_v62 = vmul.f32 %v331_v59, %v331_v59  ;;  %506 = vst [vmem:[%s1428_s18 + $0x80] sm:$0xff] %v1433_v60 }
 0x151   : > { %v591_v63 = vadd.f32 %v560_v58, %v559_v62  ;;  %v884_v0 = vpop.f32.mrb[2].mxu0  ;;  %v1438_v1 = vpop.f32.mrb[2].mxu1 }
 0x152   : > { %493 = vst [vmem:[%s1428_s18 + $0x18] sm:$0xff] %v884_v0  ;;  %v341_v2 = vpop.f32.mrb[3].mxu0  ;;  %509 = vst [vmem:[%s1428_s18 + $0x98] sm:$0xff] %v1438_v1  ;;  %v1443_v3 = vpop.f32.mrb[3].mxu1  ;;  %v562_v6 = vmul.f32 %v884_v0, %v884_v0 }
 0x153   : > { %492 = vst [vmem:[%s1428_s18 + $0x10] sm:$0xff] %v341_v2  ;;  %v523_v4 = vadd.f32 %v522_v61, %v341_v2  ;;  %v561_v5 = vmul.f32 %v341_v2, %v341_v2  ;;  %508 = vst [vmem:[%s1428_s18 + $0x90] sm:$0xff] %v1443_v3 }
 0x155   : > { %v592_v7 = vadd.f32 %v591_v63, %v561_v5  ;;  %v887_v8 = vpop.f32.mrb[4].mxu0  ;;  %v524_v9 = vadd.f32 %v884_v0, %v523_v4  ;;  %v1448_v10 = vpop.f32.mrb[4].mxu1 }
 0x156   : > { %495 = vst [vmem:[%s1428_s18 + $0x28] sm:$0xff] %v887_v8  ;;  %v351_v11 = vpop.f32.mrb[5].mxu0  ;;  %511 = vst [vmem:[%s1428_s18 + $0xa8] sm:$0xff] %v1448_v10  ;;  %v1453_v12 = vpop.f32.mrb[5].mxu1  ;;  %v564_v16 = vmul.f32 %v887_v8, %v887_v8 }
 0x157   : > { %494 = vst [vmem:[%s1428_s18 + $0x20] sm:$0xff] %v351_v11  ;;  %v525_v13 = vadd.f32 %v524_v9, %v351_v11  ;;  %v563_v14 = vmul.f32 %v351_v11, %v351_v11  ;;  %v593_v15 = vadd.f32 %v592_v7, %v562_v6  ;;  %510 = vst [vmem:[%s1428_s18 + $0xa0] sm:$0xff] %v1453_v12 }
 0x159   : > { %v594_v17 = vadd.f32 %v593_v15, %v563_v14  ;;  %v890_v18 = vpop.f32.mrb[6].mxu0  ;;  %v526_v19 = vadd.f32 %v887_v8, %v525_v13  ;;  %v1458_v20 = vpop.f32.mrb[6].mxu1 }
 0x15a   : > { %497 = vst [vmem:[%s1428_s18 + $0x38] sm:$0xff] %v890_v18  ;;  %v361_v21 = vpop.f32.mrb[7].mxu0  ;;  %513 = vst [vmem:[%s1428_s18 + $0xb8] sm:$0xff] %v1458_v20  ;;  %v1463_v22 = vpop.f32.mrb[7].mxu1  ;;  %v566_v26 = vmul.f32 %v890_v18, %v890_v18 }
 0x15b   : > { %496 = vst [vmem:[%s1428_s18 + $0x30] sm:$0xff] %v361_v21  ;;  %v527_v23 = vadd.f32 %v526_v19, %v361_v21  ;;  %v565_v24 = vmul.f32 %v361_v21, %v361_v21  ;;  %v595_v25 = vadd.f32 %v594_v17, %v564_v16  ;;  %512 = vst [vmem:[%s1428_s18 + $0xb0] sm:$0xff] %v1463_v22 }
 0x15d   : > { %v596_v27 = vadd.f32 %v595_v25, %v565_v24  ;;  %v893_v28 = vpop.f32.mrb[8].mxu0  ;;  %v528_v29 = vadd.f32 %v890_v18, %v527_v23  ;;  %v1468_v30 = vpop.f32.mrb[8].mxu1 }
 0x15e   : > { %499 = vst [vmem:[%s1428_s18 + $0x48] sm:$0xff] %v893_v28  ;;  %v371_v31 = vpop.f32.mrb[9].mxu0  ;;  %515 = vst [vmem:[%s1428_s18 + $0xc8] sm:$0xff] %v1468_v30  ;;  %v1473_v32 = vpop.f32.mrb[9].mxu1  ;;  %v568_v36 = vmul.f32 %v893_v28, %v893_v28 }
 0x15f   : > { %498 = vst [vmem:[%s1428_s18 + $0x40] sm:$0xff] %v371_v31  ;;  %v529_v33 = vadd.f32 %v528_v29, %v371_v31  ;;  %v567_v34 = vmul.f32 %v371_v31, %v371_v31  ;;  %v597_v35 = vadd.f32 %v596_v27, %v566_v26  ;;  %514 = vst [vmem:[%s1428_s18 + $0xc0] sm:$0xff] %v1473_v32 }
 0x161   : > { %v598_v37 = vadd.f32 %v597_v35, %v567_v34  ;;  %v896_v38 = vpop.f32.mrb[10].mxu0  ;;  %v530_v39 = vadd.f32 %v893_v28, %v529_v33  ;;  %v1478_v40 = vpop.f32.mrb[10].mxu1 }
 0x162   : > { %501 = vst [vmem:[%s1428_s18 + $0x58] sm:$0xff] %v896_v38  ;;  %v381_v41 = vpop.f32.mrb[11].mxu0  ;;  %517 = vst [vmem:[%s1428_s18 + $0xd8] sm:$0xff] %v1478_v40  ;;  %v1483_v42 = vpop.f32.mrb[11].mxu1  ;;  %v570_v46 = vmul.f32 %v896_v38, %v896_v38 }
 0x163   : > { %500 = vst [vmem:[%s1428_s18 + $0x50] sm:$0xff] %v381_v41  ;;  %v531_v43 = vadd.f32 %v530_v39, %v381_v41  ;;  %v569_v44 = vmul.f32 %v381_v41, %v381_v41  ;;  %v599_v45 = vadd.f32 %v598_v37, %v568_v36  ;;  %516 = vst [vmem:[%s1428_s18 + $0xd0] sm:$0xff] %v1483_v42 }
 0x165   : > { %v600_v47 = vadd.f32 %v599_v45, %v569_v44  ;;  %v899_v48 = vpop.f32.mrb[12].mxu0  ;;  %v532_v49 = vadd.f32 %v896_v38, %v531_v43  ;;  %v1488_v50 = vpop.f32.mrb[12].mxu1 }
 0x166   : > { %503 = vst [vmem:[%s1428_s18 + $0x68] sm:$0xff] %v899_v48  ;;  %v391_v51 = vpop.f32.mrb[13].mxu0  ;;  %519 = vst [vmem:[%s1428_s18 + $0xe8] sm:$0xff] %v1488_v50  ;;  %v1495_v52 = vpop.f32.mrb[13].mxu1  ;;  %v572_v56 = vmul.f32 %v899_v48, %v899_v48 }
 0x167   : > { %502 = vst [vmem:[%s1428_s18 + $0x60] sm:$0xff] %v391_v51  ;;  %v533_v53 = vadd.f32 %v532_v49, %v391_v51  ;;  %v571_v54 = vmul.f32 %v391_v51, %v391_v51  ;;  %v601_v55 = vadd.f32 %v600_v47, %v570_v46  ;;  %518 = vst [vmem:[%s1428_s18 + $0xe0] sm:$0xff] %v1495_v52 }
 0x169   : > { %v602_v58 = vadd.f32 %v601_v55, %v571_v54  ;;  %v902_v59 = vpop.f32.mrb[14].mxu0  ;;  %v534_v61 = vadd.f32 %v899_v48, %v533_v53  ;;  %v1507_v62 = vpop.f32.mrb[14].mxu1 }
 0x16a   : > { %505 = vst [vmem:[%s1428_s18 + $0x78] sm:$0xff] %v902_v59  ;;  %v401_v63 = vpop.f32.mrb[15].mxu0  ;;  %521 = vst [vmem:[%s1428_s18 + $0xf8] sm:$0xff] %v1507_v62  ;;  %v1512_v0 = vpop.f32.mrb[15].mxu1 }
 0x16b   : > { %504 = vst [vmem:[%s1428_s18 + $0x70] sm:$0xff] %v401_v63  ;;  %v535_v2 = vadd.f32 %v534_v61, %v401_v63  ;;  %v573_v4 = vmul.f32 %v401_v63, %v401_v63  ;;  %v603_v5 = vadd.f32 %v602_v58, %v572_v56  ;;  %520 = vst [vmem:[%s1428_s18 + $0xf0] sm:$0xff] %v1512_v0 }
 0x16c   : > { %1112 = shalt.err (!%p1109_p7)
}
 0x16d   : > { %s1113_s29 = scalar_lea.hbm %s1503_s25, 4096  ;;  %s1117_s7 = scalar_lea.hbm %s1640_s2, 8192 }
 0x16e   : > { %p1114_p9 = scmp.ne.s32.totalorder %s1503_s25, %s1113_s29  ;;  %p1118_p5 = scmp.lt.u32.totalorder %s1503_s25, %s1640_s2 }
 0x16f   : > { %p1119_p11 = scmp.lt.u32.totalorder %s1117_s7, %s1113_s29  ;;  %p1121_p4 = scmp.lt.u32.totalorder %s1113_s29, %s1503_s25 }
 0x170   : > { %p1115_p1 = pnand %p1114_p9, %p1325_p12 }
 0x171   : > { %p1120_p2 = por %p1119_p11, %p1118_p5 }
 0x172   : > { %p1116_p0 = pneg %p1115_p1 }
 0x173   : > { %p1122_p6 = por %p1121_p4, %p1120_p2 }
 0x175   : > { %p1123_p8 = pnand %p1122_p6, %p1116_p0 }
 0x177   : > { %1126 = shalt.err (!%p1123_p8)
}
 0x178   : > { %s1208_s18 = smov 128   ;;  %s1209_s20 = smov 8   ;;  %v574_v6 = vmul.f32 %v902_v59, %v902_v59  ;;  %v536_v7 = vadd.f32 %v902_v59, %v535_v2  ;;  %v604_v8 = vadd.f32 %v603_v5, %v573_v4  ;;  %v575_v9 = vmul.f32 %v1433_v60, %v1433_v60 }
 0x179   : > { %981 = dma.vmem_to_hbm [thread:$0]  (%p1325_p12), %s1505_s8, 4096, %s1503_s25, %s632_s5, %s1208_s18, %s1208_s18, %s1209_s20   ;;  %v576_v14 = vmul.f32 %v1424_v57, %v1424_v57  ;;  %v577_v17 = vmul.f32 %v1443_v3, %v1443_v3  ;;  %v578_v21 = vmul.f32 %v1438_v1, %v1438_v1  ;;  %v589_v48 = vmul.f32 %v1512_v0, %v1512_v0 }
 0x17a   : > { %v605_v11 = vadd.f32 %v604_v8, %v574_v6  ;;  %v537_v13 = vadd.f32 %v536_v7, %v1433_v60  ;;  %v579_v60 = vmul.f32 %v1453_v12, %v1453_v12  ;;  %s789_s8 = sshll.u32 %s1376_s6, 1  ;;  %s794_s9 = sshll.u32 %s1252_s16, 5  ;;  %vm628_vm0 = vcmask 1040384  }
 0x17b   : > { %s214_s4 = scalar_lea.vmem [#allocation8], %s789_s8  ;;  %s1594_s27 = scalar_lea.hbm %s1641_s3, %s794_s9 }
 0x17c   : > { %v606_v15 = vadd.f32 %v605_v11, %v575_v9  ;;  %v538_v16 = vadd.f32 %v1424_v57, %v537_v13  ;;  %v580_v57 = vmul.f32 %v1448_v10, %v1448_v10  ;;  %s666_s25 = sshll.u32 %s214_s4, 4  ;;  %s637_s28 = scalar_lea.sflag [#allocation9], %s1376_s6  ;;  %s1596_s25 = int_to_ptr.vmem [resolvable:$true] %s666_s25 }
 0x17d   : > { %s1127_s23 = scalar_lea.vmem %s1596_s25, 32  ;;  %s1210_s16 = smov [#allocation8]  }
 0x17e   : > { %v539_v18 = vadd.f32 %v538_v16, %v1443_v3  ;;  %v607_v19 = vadd.f32 %v606_v15, %v576_v14  ;;  %v581_v3 = vmul.f32 %v1463_v22, %v1463_v22  ;;  %p1128_p10 = scmp.ne.s32.totalorder %s1596_s25, %s1127_s23  ;;  %s1131_s29 = sshll.u32 %s1210_s16, 4  ;;  %s1132_s29 = int_to_ptr.vmem [resolvable:$false] %s1131_s29 }
 0x17f   : > { %s1133_s30 = scalar_lea.vmem %s1132_s29, 64  ;;  %p1134_p7 = scmp.lt.s32.totalorder %s1596_s25, %s1132_s29 }
 0x180   : > { %v608_v23 = vadd.f32 %v607_v19, %v577_v17  ;;  %v540_v24 = vadd.f32 %v1438_v1, %v539_v18  ;;  %v582_v1 = vmul.f32 %v1458_v20, %v1458_v20  ;;  %p1129_p13 = pnand %p1128_p10, %p1325_p12  ;;  %p1135_p9 = scmp.lt.s32.totalorder %s1133_s30, %s1127_s23 }
 0x182   : > { %v541_v25 = vadd.f32 %v540_v24, %v1453_v12  ;;  %v609_v26 = vadd.f32 %v608_v23, %v578_v21  ;;  %v583_v12 = vmul.f32 %v1473_v32, %v1473_v32  ;;  %p1130_p3 = pneg %p1129_p13  ;;  %p1136_p1 = por %p1135_p9, %p1134_p7 }
 0x184   : > { %v610_v27 = vadd.f32 %v609_v26, %v579_v60  ;;  %v542_v28 = vadd.f32 %v1448_v10, %v541_v25  ;;  %v584_v10 = vmul.f32 %v1468_v30, %v1468_v30  ;;  %p1137_p0 = pnand %p1136_p1, %p1130_p3 }
 0x186   : > { %v543_v29 = vadd.f32 %v542_v28, %v1463_v22  ;;  %v611_v31 = vadd.f32 %v610_v27, %v580_v57  ;;  %v585_v22 = vmul.f32 %v1483_v42, %v1483_v42 }
 0x188   : > { %v612_v33 = vadd.f32 %v611_v31, %v581_v3  ;;  %v544_v34 = vadd.f32 %v1458_v20, %v543_v29  ;;  %v586_v20 = vmul.f32 %v1478_v40, %v1478_v40 }
 0x18a   : > { %v545_v35 = vadd.f32 %v544_v34, %v1473_v32  ;;  %v613_v36 = vadd.f32 %v612_v33, %v582_v1  ;;  %v587_v32 = vmul.f32 %v1495_v52, %v1495_v52 }
 0x18c   : > { %v614_v37 = vadd.f32 %v613_v36, %v583_v12  ;;  %v546_v38 = vadd.f32 %v1468_v30, %v545_v35  ;;  %v588_v30 = vmul.f32 %v1488_v50, %v1488_v50 }
 0x18e   : > { %v547_v39 = vadd.f32 %v546_v38, %v1483_v42  ;;  %v615_v41 = vadd.f32 %v614_v37, %v584_v10 }
 0x190   : > { %v616_v43 = vadd.f32 %v615_v41, %v585_v22  ;;  %v548_v44 = vadd.f32 %v1478_v40, %v547_v39  ;;  %v590_v40 = vmul.f32 %v1507_v62, %v1507_v62 }
 0x192   : > { %v549_v45 = vadd.f32 %v548_v44, %v1495_v52  ;;  %v617_v46 = vadd.f32 %v616_v43, %v586_v20 }
 0x194   : > { %v618_v47 = vadd.f32 %v617_v46, %v587_v32  ;;  %v550_v42 = vadd.f32 %v1488_v50, %v549_v45 }
 0x196   : > { %v551_v49 = vadd.f32 %v550_v42, %v1512_v0  ;;  %v619_v51 = vadd.f32 %v618_v47, %v588_v30 }
 0x198   : > { %v552_v52 = vadd.f32 %v1507_v62, %v551_v49  ;;  %v620_v53 = vadd.f32 %v619_v51, %v589_v48 }
 0x19a   : > { %v553_v54 = vrot.slane %v552_v52, 4  ;;  %v621_v55 = vadd.f32 %v620_v53, %v590_v40 }
 0x19c   : > { %v554_v56 = vadd.f32 %v553_v54, %v552_v52  ;;  %v622_v58 = vrot.slane %v621_v55, 4 }
 0x19e   : > { %v555_v59 = vrot.slane %v554_v56, 2  ;;  %v623_v61 = vadd.f32 %v622_v58, %v621_v55 }
 0x1a0   : > { %v556_v50 = vadd.f32 %v555_v59, %v554_v56  ;;  %v624_v63 = vrot.slane %v623_v61, 2 }
 0x1a2   : > { %v557_v2 = vrot.slane %v556_v50, 1  ;;  %v625_v0 = vadd.f32 %v624_v63, %v623_v61 }
 0x1a4   : > { %v626_v4 = vrot.slane %v625_v0, 1  ;;  %v558_v62 = vadd.f32 %v557_v2, %v556_v50 }
 0x1a6   : > { %v627_v5 = vadd.f32 %v626_v4, %v625_v0 }
 0x1a8   : > { %v629_v6 = vsel %vm628_vm0, %v558_v62, %v627_v5 }
 0x1a9   : > { %630 = vst [vmem:[%s214_s4] sm:$0x3] %v629_v6 }
 0x1aa   : > { %1140 = shalt.err (!%p1137_p0)
}
 0x1ab   : > { %s1141_s6 = scalar_lea.hbm %s1594_s27, 32  ;;  %s1145_s10 = scalar_lea.hbm %s1641_s3, 64 }
 0x1ac   : > { %p1142_p5 = scmp.ne.s32.totalorder %s1594_s27, %s1141_s6  ;;  %p1146_p4 = scmp.lt.u32.totalorder %s1594_s27, %s1641_s3 }
 0x1ad   : > { %p1147_p6 = scmp.lt.u32.totalorder %s1145_s10, %s1141_s6  ;;  %p1149_p10 = scmp.lt.u32.totalorder %s1141_s6, %s1594_s27 }
 0x1ae   : > { %p1143_p11 = pnand %p1142_p5, %p1325_p12 }
 0x1af   : > { %p1148_p8 = por %p1147_p6, %p1146_p4 }
 0x1b0   : > { %p1144_p2 = pneg %p1143_p11 }
 0x1b1   : > { %p1150_p13 = por %p1149_p10, %p1148_p8 }
 0x1b3   : > { %p1151_p3 = pnand %p1150_p13, %p1144_p2 }
 0x1b5   : > { %1154 = shalt.err (!%p1151_p3)
}
 0x1b6   : > { %982 = dma.vmem_to_hbm [thread:$0]  (%p1325_p12), %s1596_s25, 32, %s1594_s27, %s637_s28  }
 0x1b7 PF: > { %s678_s20 = sand.u32 1, %s1189_s12   ;;  %p1656_p7 = scmp.ne.s32.totalorder %s1646_s19, 0 }
 0x1b8   : > { %p1657_p9 = scmp.ge.s32.totalorder %s1201_s15, 2  ;;  %s679_s8 = scalar_lea.sflag [#allocation4], %s678_s20 }
 0x1ba   : > { %p994_p1 = pnand %p1657_p9, %p1656_p7 }
 0x1bc   : > { %1180 = dma.done.wait (!%p994_p1), %s679_s8, 4096  }
 0x1bd   : > { %1182 = vsyncadd (!%p994_p1), %s679_s8, 4294963200  ;;  %s688_s9 = scalar_lea.sflag [#allocation9], %s678_s20 }
 0x1be   : > { %1184 = dma.done.wait (!%p994_p1), %s688_s9, 32  }
 0x1bf   : > { %1186 = vsyncadd (!%p994_p1), %s688_s9, 4294967264  ;;  %p21_p12 = scmp.ge.s32.totalorder %s1287_s24, 4   ;;  %s1658_s12 = smov %s1193_s13 }
 0x1c0   : > { %s1659_s13 = smov %s1197_s14  ;;  %s1660_s14 = smov %s1321_s17 }
 0x1c1   : > { %s1661_s15 = smov %s1287_s24  ;;  %23 = sbr.rel (!%p21_p12) target bundleno = 8 (0x8), region = 94 }
 0x1c8   :  { %693 = vsyncpa [#allocation3], 1 }
 0x1c9   :  { %695 = vsyncpa [#allocation3 + $0x1], 1 }
 0x1ca   :  { %696 = vsyncpa [#allocation6], 1 }
 0x1cb   :  { %697 = vsyncpa [#allocation4], 1 }
 0x1cc   :  { %699 = vsyncpa [#allocation4 + $0x1], 1 }
 0x1cd   :  { %700 = vsyncpa [#allocation9], 1 }
 0x1ce   :  { %702 = vsyncpa [#allocation9 + $0x1], 1 }

</bundles_post_ra>
